<compile_context>
chip_gen: v7x
topology: tpu7x:2x2x1
jax: 0.10.0
libtpu: 0.0.40
codegen_flags: <defaults>
</compile_context>

<pallas_src>
import functools

import jax
import jax.numpy as jnp
from jax import lax
from jax.experimental import pallas as pl
from jax.experimental.pallas import tpu as pltpu


CHUNK = 150  # fixed chunk width from the PyTorch module


def _round_up(x, m):
    return (x + m - 1) // m * m


def _mlp_rsna2_kernel(x_ref, w_ref, o_ref, *, tk, k_valid, nk_per_split, mask_tail):
    """One grid step: accumulate one K-tile of the fused GEMM.

    Grid = (num_splits, nk_per_split); split axis is 'parallel' (megacore),
    K axis is the reduction ('arbitrary').

    x_ref: (B, tk)    K-tile of the flat input
    w_ref: (NC, tk)   matching K-tile of the flattened weight (K in lanes)
    o_ref: (B, NC) f32 partial sum for this split (resident across K steps)
    """
    k = pl.program_id(1)

    @pl.when(k == 0)
    def _():
        o_ref[...] = jnp.zeros_like(o_ref)

    x = x_ref[...]
    if mask_tail:
        # Zero the overhang of the last K-tile (x itself is NOT padded in HBM).
        s = pl.program_id(0)
        lane = lax.broadcasted_iota(jnp.int32, x.shape, 1)
        kpos = (s * nk_per_split + k) * tk + lane
        x = jnp.where(kpos < k_valid, x, jnp.zeros_like(x))

    # Contract the lane (K) dims of x (B, tk) and w (NC, tk) -> (B, NC).
    o_ref[...] += lax.dot_general(
        x, w_ref[...],
        dimension_numbers=(((1,), (1,)), ((), ())),
        preferred_element_type=jnp.float32)


def mlp_rsna2_forward(x, weights, biases):
    """x: (B, num_chunks*150), weights: (num_chunks, 150, NC), biases: (num_chunks, NC).

    For maximum bandwidth on real workloads pass x / weights as bfloat16 — the
    kernel streams whatever dtype it is given and accumulates in float32.
    """
    B, input_num = x.shape
    num_chunks, chunk, num_classes = weights.shape
    assert chunk == CHUNK and input_num == num_chunks * CHUNK
    K = input_num

    # Flatten the weight with K as the *lane* (last) dim: (NC, K).
    # (In production, store the weights in this layout to avoid the transpose.)
    w_flat = jnp.transpose(weights, (2, 0, 1)).reshape(num_classes, K)
    bias_mean = jnp.mean(biases.astype(jnp.float32), axis=0)          # (NC,)
    inv_chunks = jnp.float32(1.0 / num_chunks)

    x_itemsize = jnp.dtype(x.dtype).itemsize
    w_itemsize = jnp.dtype(w_flat.dtype).itemsize

    # ---- Generation-aware VMEM budget (padded tile footprints). ----
    try:
        vmem_cap = int(pltpu.get_tpu_info().vmem_capacity_bytes)
    except Exception:
        vmem_cap = 64 * 1024 * 1024            # conservative: v7x per-core VMEM
    # ~40 MiB on v7x (64 MiB physical), ~80 MiB on v5e/v6e (128 MiB physical).
    vmem_limit = min(vmem_cap * 5 // 8, 96 * 1024 * 1024)
    stream_budget = vmem_limit - 4 * 1024 * 1024   # headroom: resident out + scratch

    # Real per-K-element bytes of the double-buffered streams, including
    # sublane padding (f32 rows pad to 8, bf16 rows to 16, ...).
    x_rows_p = _round_up(B, 32 // x_itemsize)
    w_rows_p = _round_up(num_classes, 32 // w_itemsize)
    per_k_bytes = x_rows_p * x_itemsize + w_rows_p * w_itemsize

    tk_cap = max(128, (stream_budget // (2 * per_k_bytes)) // 128 * 128)

    if K <= tk_cap:
        tk, nk_total = K, 1                    # single block, no padding/mask
    else:
        tk = tk_cap
        nk_total = pl.cdiv(K, tk)

    # Split the K stream in two for v7x's two TensorCores when there are enough
    # even tiles; on single-core chips this is just a (free) sequential loop.
    num_splits = 2 if (nk_total >= 4 and nk_total % 2 == 0) else 1
    nk_per_split = nk_total // num_splits

    k_blocks = nk_total * tk
    mask_tail = k_blocks != K

    # Only the tiny weight is zero-padded so its blocks tile exactly; x keeps
    # its original HBM buffer (the in-kernel mask zeroes the tail overhang).
    if mask_tail:
        w_flat = jnp.pad(w_flat, ((0, 0), (0, k_blocks - K)))

    kernel = functools.partial(
        _mlp_rsna2_kernel,
        tk=tk, k_valid=K, nk_per_split=nk_per_split, mask_tail=mask_tail)

    cost = pl.CostEstimate(
        flops=int(2 * B * K * num_classes),
        transcendentals=0,
        bytes_accessed=int(B * K * x_itemsize
                           + K * num_classes * w_itemsize
                           + num_splits * B * num_classes * 4))

    # NOTE: for large batches, additionally tile B (tm matched to the MXU) on a
    # leading 'parallel' axis; at B=2 the full-batch block is the right choice.
    partials = pl.pallas_call(
        kernel,
        out_shape=jax.ShapeDtypeStruct((num_splits, B, num_classes), jnp.float32),
        grid_spec=pltpu.PrefetchScalarGridSpec(
            num_scalar_prefetch=0,
            grid=(num_splits, nk_per_split),
            in_specs=[
                pl.BlockSpec((B, tk),
                             lambda s, k: (0, s * nk_per_split + k)),
                pl.BlockSpec((num_classes, tk),
                             lambda s, k: (0, s * nk_per_split + k)),
            ],
            out_specs=pl.BlockSpec((None, B, num_classes),
                                   lambda s, k: (s, 0, 0)),
        ),
        compiler_params=pltpu.CompilerParams(
            dimension_semantics=("parallel", "arbitrary"),
            vmem_limit_bytes=int(vmem_limit),
        ),
        cost_estimate=cost,
    )(x, w_flat)

    # Tiny epilogue on (num_splits, B, NC): combine splits, 1/C scale, mean bias.
    out = partials.sum(axis=0) * inv_chunks + bias_mean[None, :]
    return out.astype(x.dtype)


def init_params(key, num_chunks, num_classes):
    """Deterministic init mimicking nn.Linear(150, num_classes) per chunk."""
    wkey, bkey = jax.random.split(key)
    bound = 1.0 / jnp.sqrt(CHUNK)
    # stored as (in, out) per chunk, matching the pure-JAX reference below
    weights = jax.random.uniform(
        wkey, (num_chunks, CHUNK, num_classes), jnp.float32, -bound, bound)
    biases = jax.random.uniform(
        bkey, (num_chunks, num_classes), jnp.float32, -bound, bound)
    return weights, biases


def reference_forward(x, weights, biases):
    """Pure-JAX reference matching the PyTorch forward exactly (per-chunk loop)."""
    num_chunks = weights.shape[0]
    xs = []
    for i in range(num_chunks):
        chunk = x[:, i * CHUNK:(i + 1) * CHUNK]
        xs.append(chunk @ weights[i] + biases[i])
    return jnp.stack(xs, axis=1).mean(axis=1)


if __name__ == "__main__":
    key = jax.random.PRNGKey(0)
    xkey, pkey = jax.random.split(key)

    # Small shapes consistent with the module: input_num must be a multiple of 150.
    batch = 2
    num_classes = 6
    num_chunks = 4
    input_num = num_chunks * CHUNK  # 600

    x = jax.random.normal(xkey, (batch, input_num), jnp.float32)
    weights, biases = init_params(pkey, num_chunks, num_classes)

    out = mlp_rsna2_forward(x, weights, biases)
    out = jax.block_until_ready(out)

    ref = reference_forward(x, weights, biases)
    assert out.shape == (batch, num_classes)
    assert jnp.allclose(out, ref, atol=1e-5, rtol=1e-5), "mismatch vs reference"

    print("KERNEL_OK")
</pallas_src>

<mosaic_0001>
module attributes {stable_mosaic.version = 11 : i64} {
  func.func @_mlp_rsna2_kernel(%arg0: i32, %arg1: i32, %arg2: memref<2x600xf32, #tpu.memory_space<vmem>>, %arg3: memref<6x600xf32, #tpu.memory_space<vmem>>, %arg4: memref<1x2x6xf32, #tpu.memory_space<vmem>>) attributes {dimension_semantics = [#tpu.dimension_semantics<parallel>, #tpu.dimension_semantics<arbitrary>], iteration_bounds = array<i64: 1, 1>, scalar_prefetch = 0 : i64, scratch_operands = 0 : i64, tpu.core_type = #tpu.core_type<tc>, window_params = [{transform_indices = @transform_0, window_bounds = array<i64: 2, 600>}, {transform_indices = @transform_1, window_bounds = array<i64: 6, 600>}, {transform_indices = @transform_2, window_bounds = array<i64: 1, 2, 6>}]} {
    %c0_i32 = arith.constant 0 : i32
    %0 = arith.cmpi eq, %arg1, %c0_i32 : i32
    %1 = arith.extui %0 : i1 to i32
    %c0_i32_0 = arith.constant 0 : i32
    %2 = arith.cmpi ne, %1, %c0_i32_0 : i32
    scf.if %2 {
      %cst_10 = arith.constant 0.000000e+00 : f32
      %12 = vector.broadcast %cst_10 : f32 to vector<2x6xf32>
      %c0_11 = arith.constant 0 : index
      %c0_12 = arith.constant 0 : index
      %c0_13 = arith.constant 0 : index
      %13 = vector.load %arg4[%c0_11, %c0_12, %c0_13] : memref<1x2x6xf32, #tpu.memory_space<vmem>>, vector<1x2x6xf32>
      %14 = vector.shape_cast %13 : vector<1x2x6xf32> to vector<2x6xf32>
      %15 = vector.shape_cast %12 : vector<2x6xf32> to vector<1x2x6xf32>
      tpu.vector_store %arg4[%c0_11, %c0_12, %c0_13], %15 {strides = array<i32>} : memref<1x2x6xf32, #tpu.memory_space<vmem>>, vector<1x2x6xf32>,
    } else {
    }
    %c0 = arith.constant 0 : index
    %c0_1 = arith.constant 0 : index
    %3 = vector.load %arg2[%c0, %c0_1] : memref<2x600xf32, #tpu.memory_space<vmem>>, vector<2x600xf32>
    %c0_2 = arith.constant 0 : index
    %c0_3 = arith.constant 0 : index
    %c0_4 = arith.constant 0 : index
    %4 = vector.load %arg4[%c0_2, %c0_3, %c0_4] : memref<1x2x6xf32, #tpu.memory_space<vmem>>, vector<1x2x6xf32>
    %5 = vector.shape_cast %4 : vector<1x2x6xf32> to vector<2x6xf32>
    %c0_5 = arith.constant 0 : index
    %c0_6 = arith.constant 0 : index
    %6 = vector.load %arg3[%c0_5, %c0_6] : memref<6x600xf32, #tpu.memory_space<vmem>>, vector<6x600xf32>
    %cst = arith.constant dense<0.000000e+00> : vector<2x6xf32>
    %7 = tpu.matmul %3, %6, %cst {dimension_numbers = #tpu.dot_dimension_numbers<[1], [1], [0], [0], [0, 0, 1, 0], [], []>} : vector<2x600xf32>, vector<6x600xf32>, vector<2x6xf32> -> vector<2x6xf32>
    %8 = arith.addf %5, %7 : vector<2x6xf32>
    %c0_7 = arith.constant 0 : index
    %c0_8 = arith.constant 0 : index
    %c0_9 = arith.constant 0 : index
    %9 = vector.load %arg4[%c0_7, %c0_8, %c0_9] : memref<1x2x6xf32, #tpu.memory_space<vmem>>, vector<1x2x6xf32>
    %10 = vector.shape_cast %9 : vector<1x2x6xf32> to vector<2x6xf32>
    %11 = vector.shape_cast %8 : vector<2x6xf32> to vector<1x2x6xf32>
    tpu.vector_store %arg4[%c0_7, %c0_8, %c0_9], %11 {strides = array<i32>} : memref<1x2x6xf32, #tpu.memory_space<vmem>>, vector<1x2x6xf32>,
    return
  }
  func.func @transform_0(%arg0: i32, %arg1: i32) -> (i32, i32) {
    %c1_i32 = arith.constant 1 : i32
    %0 = arith.muli %arg0, %c1_i32 : i32
    %1 = arith.addi %0, %arg1 : i32
    %c0_i32 = arith.constant 0 : i32
    %c0_i32_0 = arith.constant 0 : i32
    return %c0_i32, %1 : i32, i32
  }
  func.func @transform_1(%arg0: i32, %arg1: i32) -> (i32, i32) {
    %c1_i32 = arith.constant 1 : i32
    %0 = arith.muli %arg0, %c1_i32 : i32
    %1 = arith.addi %0, %arg1 : i32
    %c0_i32 = arith.constant 0 : i32
    %c0_i32_0 = arith.constant 0 : i32
    return %c0_i32, %1 : i32, i32
  }
  func.func @transform_2(%arg0: i32, %arg1: i32) -> (i32, i32, i32) {
    %c0_i32 = arith.constant 0 : i32
    %c0_i32_0 = arith.constant 0 : i32
    %c0_i32_1 = arith.constant 0 : i32
    return %arg0, %c0_i32, %c0_i32_0 : i32, i32, i32
  }
}

</mosaic_0001>

<bundles_post_ra>
// kernel: tpu_custom_call.1
= control target key start
LH: loop header
LB: loop body
LE: loop exit
PB: predicated region body
PF: predicated region fallthrough
CT: control target
= control target key end

     0   :  { %7 = vsyncpa [#allocation3], 0  ;;  %s474_s0 = inlined_call_operand.hbm [shape: f32[2,600], index: 0, kind: input, shape index: {}]   ;;  %s475_s1 = inlined_call_operand.hbm [shape: f32[6,600], index: 1, kind: input, shape index: {}]   ;;  %s476_s2 = inlined_call_operand.hbm [shape: f32[1,2,6], index: 2, kind: output, shape index: {}]  }
   0x1   :  { %8 = vsyncpa [#allocation6], 0 }
   0x2   :  { %9 = vsyncpa [#allocation4], 0  ;;  %s415_s9 = smov [#allocation2]   ;;  %s416_s11 = smov [#allocation5]  }
   0x3   :  { %s20_s10 = sshll.u32 %s415_s9, 4  ;;  %s34_s12 = sshll.u32 %s416_s11, 4  ;;  %s21_s10 = int_to_ptr.vmem [resolvable:$true] %s20_s10  ;;  %s35_s12 = int_to_ptr.vmem [resolvable:$true] %s34_s12 }
   0x4   :  { %s343_s15 = scalar_lea.hbm %s474_s0, 160 }
   0x5   :  { %p344_p0 = scmp.ne.s32.totalorder %s474_s0, %s343_s15  ;;  %p347_p1 = scmp.lt.u32.totalorder %s343_s15, %s474_s0 }
   0x7   :  { %p349_p2 = pnand %p347_p1, %p344_p0 }
   0x9   :  { %352 = shalt.err (!%p349_p2)
}
   0xa   :  { %s353_s20 = scalar_lea.vmem %s21_s10, 160  ;;  %p358_p4 = scmp.lt.s32.totalorder %s21_s10, %s21_s10 }
   0xb   :  { %p354_p3 = scmp.ne.s32.totalorder %s21_s10, %s353_s20  ;;  %p359_p5 = scmp.lt.s32.totalorder %s353_s20, %s353_s20 }
   0xd   :  { %p360_p6 = por %p359_p5, %p358_p4 }
   0xf   :  { %p361_p7 = pnand %p360_p6, %p354_p3 }
  0x11   :  { %364 = shalt.err (!%p361_p7)
}
  0x12   :  { %23 = dma.hbm_to_vmem [thread:$0]  %s474_s0, 160, %s21_s10, [#allocation3]  }
  0x13   :  { %s365_s25 = scalar_lea.hbm %s475_s1, 640 }
  0x14   :  { %p366_p8 = scmp.ne.s32.totalorder %s475_s1, %s365_s25  ;;  %p369_p9 = scmp.lt.u32.totalorder %s365_s25, %s475_s1 }
  0x16   :  { %p371_p10 = pnand %p369_p9, %p366_p8 }
  0x18   :  { %374 = shalt.err (!%p371_p10)
}
  0x19   :  { %s375_s30 = scalar_lea.vmem %s35_s12, 640  ;;  %p380_p12 = scmp.lt.s32.totalorder %s35_s12, %s35_s12 }
  0x1a   :  { %p376_p11 = scmp.ne.s32.totalorder %s35_s12, %s375_s30  ;;  %p381_p13 = scmp.lt.s32.totalorder %s375_s30, %s375_s30 }
  0x1c   :  { %p382_p0 = por %p381_p13, %p380_p12 }
  0x1e   :  { %p383_p1 = pnand %p382_p0, %p376_p11 }
  0x20   :  { %386 = shalt.err (!%p383_p1)
}
  0x21   :  { %37 = dma.hbm_to_vmem [thread:$0]  %s475_s1, 640, %s35_s12, [#allocation6]  }
  0x22   :  { %409 = dma.done.wait [#allocation3], 160  }
  0x23   :  { %410 = vsyncadd [#allocation3], 4294967136 }
  0x24   :  { %411 = dma.done.wait [#allocation6], 640  }
  0x25   :  { %412 = vsyncadd [#allocation6], 4294966656  ;;  %v68_v0 = vlaneseq  ;;  %vm52_vm0 = vcmask 41984   ;;  %v417_v1 = vmov 1983009808   ;;  %v418_v3 = vmov 0.0  }
  0x26   :  { %v66_v2 = vunpack.c.l.s4 %v417_v1  ;;  %53 = vst.msk [vmem:[#allocation7] sm:$0x3] %vm52_vm0, %v418_v3  ;;  %v58_v7 = vld [vmem:[#allocation5 + $0x8] sm:$0x3f]  ;;  %v57_v8 = vld [vmem:[#allocation5] sm:$0x3f] }
  0x27   :  { %v69_v4 = vshrl.u32 %v68_v0, 7  ;;  %v60_v9 = vld [vmem:[#allocation5 + $0x18] sm:$0x3f]  ;;  %98 = vmatprep.subr.mxu0 %v58_v7  ;;  %v59_v11 = vld [vmem:[#allocation5 + $0x10] sm:$0x3f]  ;;  %vm92_vm1 = vcmask 719872  }
  0x28   :  { %v67_v5 = vunpack.c.0.s8 %v66_v2  ;;  %168 = vmatprep.subr.mxu1 %v60_v9  ;;  %v54_v10 = vld [vmem:[#allocation2] sm:$0xff]  ;;  %99 = vmatpush1.xpose.msra.mxu0 %v57_v8  ;;  %v61_v16 = vld [vmem:[#allocation5 + $0x20] sm:$0x3f]  ;;  %vm419_vm2 = vmmov 0   ;;  %s420_s1 = smov [#allocation7]  }
  0x29   :  { %169 = vmatpush1.xpose.msra.mxu1 %v59_v11  ;;  %v64_v13 = vcombine.high %v54_v10, %v54_v10  ;;  %332 = vmatprep.subr.mxu0 %v418_v3  ;;  %v327_v18 = vld.sshfl [vmem:[#allocation2 + $0x8] sm:$0x3 pattern:$0x76325410]  ;;  %s317_s4 = sshll.u32 %s420_s1, 4  ;;  %s318_s4 = int_to_ptr.vmem [resolvable:$true] %s317_s4 }
  0x2a   :  { %v70_v6 = vsub.s32 %v67_v5, %v69_v4  ;;  %s387_s5 = scalar_lea.vmem %s318_s4, 32  ;;  %p392_p3 = scmp.lt.s32.totalorder %s318_s4, %s318_s4 }
  0x2b   :  { %p388_p2 = scmp.ne.s32.totalorder %s318_s4, %s387_s5  ;;  %p393_p4 = scmp.lt.s32.totalorder %s387_s5, %s387_s5 }
  0x2c   :  { %v71_v12 = vrot.slane %v54_v10, %v70_v6  ;;  %v78_v15 = vrot.slane %v64_v13, %v70_v6 }
  0x2d   :  { %v56_v24 = vld [vmem:[#allocation7] sm:$0x3]  ;;  %p394_p5 = por %p393_p4, %p392_p3 }
  0x2e   :  { %v79_v14 = vcombine.high %v71_v12, %v71_v12  ;;  %v80_v17 = vcombine.high %v78_v15, %v78_v15 }
  0x2f   :  { %p395_p6 = pnand %p394_p5, %p388_p2 }
  0x30   :  { %162 = vmatprep.mubr.f32.mxu0 %v79_v14  ;;  %232 = vmatprep.mubr.f32.mxu1 %v80_v17 }
  0x31   :  { %163 = vmatmul.mubr.f32.vlgmr.msra.gmra.mrb[0].mxu0 %v71_v12  ;;  %233 = vmatmul.mubr.f32.vlgmr.msra.gmra.mrb[0].mxu1 %v78_v15 }
  0x32   :  { %333 = vmatpush3.xpose.msk.msra.mxu0 %vm92_vm1, %v61_v16  ;;  %334 = vmatprep.mubr.msk.f32.mxu0 %vm419_vm2, %v418_v3 }
  0x35   :  { %335 = vmatmul.mubr.msk.f32.vlgmr.msra.gmra.mrb[2].mxu0 %vm92_vm1, %v327_v18 }
 0x104   :  { %v164_v19 = vpop.f32.mrb[0].mxu0  ;;  %v234_v21 = vpop.f32.mrb[0].mxu1 }
 0x105   :  { %v166_v20 = vpop.f32.mrb[1].mxu0  ;;  %v235_v22 = vadd.f32 %v234_v21, %v164_v19  ;;  %v236_v23 = vpop.f32.mrb[1].mxu1 }
 0x108   :  { %v304_v25 = vpop.f32.mrb[2].mxu0 }
 0x109   :  { %v305_v26 = vadd.f32 %v304_v25, %v235_v22  ;;  %v336_v27 = vpop.f32.mrb[3].mxu0 }
 0x10b   :  { %v308_v28 = vadd.f32 %v305_v26, %v56_v24 }
 0x10d   :  { %310 = vst.msk [vmem:[#allocation7] sm:$0x3] %vm52_vm0, %v308_v28 }
 0x10e   :  { %398 = shalt.err (!%p395_p6)
}
 0x10f   :  { %s399_s8 = scalar_lea.hbm %s476_s2, 32 }
 0x110   :  { %p400_p7 = scmp.ne.s32.totalorder %s476_s2, %s399_s8  ;;  %p403_p8 = scmp.lt.u32.totalorder %s399_s8, %s476_s2 }
 0x112   :  { %p405_p9 = pnand %p403_p8, %p400_p7 }
 0x114   :  { %408 = shalt.err (!%p405_p9)
}
 0x115   :  { %320 = dma.vmem_to_hbm [thread:$0]  %s318_s4, 32, %s476_s2, [#allocation4]  }
 0x116   :  { %413 = dma.done.wait [#allocation4], 32  }
 0x117   :  { %414 = vsyncadd [#allocation4], 4294967264 }
 0x118   :  { %324 = vsyncpa [#allocation3], 1 }
 0x119   :  { %325 = vsyncpa [#allocation6], 1 }
 0x11a   :  { %326 = vsyncpa [#allocation4], 1 }

</bundles_post_ra>
